<compile_context>
chip_gen: v6e
topology: v6e:2x2x1
jax: 0.10.0
libtpu: 0.0.40
codegen_flags: <defaults>
</compile_context>

<pallas_src>
import math
from functools import partial

import jax
import jax.numpy as jnp
from jax.experimental import pallas as pl
from jax.experimental.pallas import tpu as pltpu


C_PAD = 128               # lane-dense channel padding for all node-feature matrices
_SINGLE_BLOCK_MAX = 512   # graphs up to this many nodes run as a single (1,1) grid step
_TILE = 256               # dst/src tile for larger graphs (MXU-shaped on v6e/v7x)


def _round_up(v, m):
    return ((v + m - 1) // m) * m


# ----------------------------------------------------------------------------
# Fused GCN kernel
# ----------------------------------------------------------------------------
def _gcn_fused_kernel(a_ref, xk_ref, xi_ref, dk_ref, di_ref, w_ref, b_ref, *rest,
                      apply_relu, has_x2, has_score, score_col, single_block):
    """One (dst-block i, src-block k) step of a fused GCNConv.

        out[d] = dis[d] * sum_s A[d,s] * dis[s] * (XW)[s]     (aggregation)
               + dis[d]^2 * (XW)[d]                           (analytic self-loop)
               + b                                            (+ ReLU, + TopK score)

    dis = (rowsum(A) + 1)^-1/2 is precomputed in the wrapper; A must not contain
    self-loops (they are added analytically, so no NxN identity is ever built).
    The XW transform is recomputed per dst-block (trades a little MXU work for
    one fewer pallas_call and no HBM round-trip of the transformed features).
    """
    pos = 0
    if has_x2:
        x2k_ref, x2i_ref, w2_ref = rest[pos], rest[pos + 1], rest[pos + 2]
        pos += 3
    if has_score:
        p_ref = rest[pos]
        pos += 1
    o_ref = rest[pos]
    acc_ref = rest[pos + 1]

    k = pl.program_id(1)
    nk = pl.num_programs(1)

    @pl.when(k == 0)
    def _init():
        acc_ref[...] = jnp.zeros_like(acc_ref)

    def _xw(x_ref_, x2_ref_):
        # bf16 MXU operands, f32 accumulation
        xw = jnp.dot(x_ref_[...].astype(jnp.bfloat16),
                     w_ref[...].astype(jnp.bfloat16),
                     preferred_element_type=jnp.float32)
        if has_x2:
            xw = xw + jnp.dot(x2_ref_[...].astype(jnp.bfloat16),
                              w2_ref[...].astype(jnp.bfloat16),
                              preferred_element_type=jnp.float32)
        return xw

    # h_k = dis_k * (X_k @ W [+ X2_k @ W2]) ;  acc_i += A[i,k] @ h_k
    h_k = dk_ref[...] * _xw(xk_ref, x2k_ref if has_x2 else None)
    acc_ref[...] += jnp.dot(a_ref[...].astype(jnp.bfloat16),
                            h_k.astype(jnp.bfloat16),
                            preferred_element_type=jnp.float32)

    @pl.when(k == nk - 1)
    def _finalize():
        di = di_ref[...]
        if single_block:
            h_i = h_k                                   # grid (1,1): dst block == src block
        else:
            h_i = di * _xw(xi_ref, x2i_ref if has_x2 else None)
        y = di * (acc_ref[...] + h_i) + b_ref[...]
        if apply_relu:
            y = jnp.maximum(y, 0.0)
        if has_score:
            # p is pre-normalized (p/||p||) and zero-padded, so padded/score lanes
            # of y contribute nothing to the score.
            s = jnp.tanh(jnp.sum(y * p_ref[...], axis=-1, keepdims=True))
            lanes = jax.lax.broadcasted_iota(jnp.int32, y.shape, 1)
            y = jnp.where(lanes == score_col, s, y)     # stash score in a padded lane
        o_ref[...] = y


# ----------------------------------------------------------------------------
# Wrapper
# ----------------------------------------------------------------------------
def gcn_conv(adj, dis, x, w, b, *, p=None, x2=None, w2=None,
             apply_relu=True, score_col=0):
    """Fused GCNConv (+ optional TopK score) over a dense adjacency.

    adj: (n, n) dense weighted adjacency A[dst, src] (bf16/f32), no self-loops.
    dis: (n, 1) f32 = (rowsum(A) + 1)^-1/2.
    x:   (n, C_PAD) f32 node features (zero-padded to 128 lanes).
    w:   (C_PAD, C_PAD) zero-padded weight;  b: (1, C_PAD) zero-padded bias.
    p:   optional (1, C_PAD) pre-normalized TopK projection -> score written to
         output lane `score_col`.
    x2/w2: optional second input/weight (replaces concat([x, x2]) @ W).
    """
    n, c = x.shape
    has_x2 = x2 is not None
    has_score = p is not None

    if n <= _SINGLE_BLOCK_MAX:
        tm = tk = _round_up(n, 8)
    else:
        tm = tk = _TILE
    n_pad = _round_up(n, tm)
    pad_rows = ((0, n_pad - n), (0, 0))

    a_p = jnp.pad(adj, ((0, n_pad - n), (0, n_pad - n)))
    x_p = jnp.pad(x, pad_rows)
    d_p = jnp.pad(dis, pad_rows, constant_values=1.0)

    in_specs = [
        pl.BlockSpec((tm, tk), lambda i, k: (i, k)),   # A[dst, src]
        pl.BlockSpec((tk, c), lambda i, k: (k, 0)),    # X   (src block)
        pl.BlockSpec((tm, c), lambda i, k: (i, 0)),    # X   (dst block, self-loop)
        pl.BlockSpec((tk, 1), lambda i, k: (k, 0)),    # dis (src block)
        pl.BlockSpec((tm, 1), lambda i, k: (i, 0)),    # dis (dst block)
        pl.BlockSpec((c, c), lambda i, k: (0, 0)),     # W
        pl.BlockSpec((1, c), lambda i, k: (0, 0)),     # b
    ]
    args = [a_p, x_p, x_p, d_p, d_p, w, b]
    if has_x2:
        x2_p = jnp.pad(x2, pad_rows)
        in_specs += [
            pl.BlockSpec((tk, c), lambda i, k: (k, 0)),
            pl.BlockSpec((tm, c), lambda i, k: (i, 0)),
            pl.BlockSpec((c, c), lambda i, k: (0, 0)),
        ]
        args += [x2_p, x2_p, w2]
    if has_score:
        in_specs.append(pl.BlockSpec((1, c), lambda i, k: (0, 0)))
        args.append(p)

    grid = (n_pad // tm, n_pad // tk)
    n_mm = 2 if has_x2 else 1
    cost = pl.CostEstimate(
        flops=int(2 * n_pad * n_pad * c + 2 * n_mm * grid[0] * n_pad * c * c),
        transcendentals=int(n_pad if has_score else 0),
        bytes_accessed=int(a_p.dtype.itemsize * n_pad * n_pad
                           + 4 * (2 + n_mm) * n_pad * c + 4 * n_mm * c * c),
    )

    out = pl.pallas_call(
        partial(_gcn_fused_kernel, apply_relu=apply_relu, has_x2=has_x2,
                has_score=has_score, score_col=score_col,
                single_block=(grid == (1, 1))),
        out_shape=jax.ShapeDtypeStruct((n_pad, c), jnp.float32),
        grid_spec=pltpu.PrefetchScalarGridSpec(
            num_scalar_prefetch=0,
            grid=grid,
            in_specs=in_specs,
            out_specs=pl.BlockSpec((tm, c), lambda i, k: (i, 0)),
            scratch_shapes=[pltpu.VMEM((tm, c), jnp.float32)],
        ),
        compiler_params=pltpu.CompilerParams(
            dimension_semantics=("parallel", "arbitrary")),
        cost_estimate=cost,
    )(*args)
    return out[:n]


def gcn_degree_inv_sqrt(adj):
    """dis[d] = (sum_s A[d,s] + 1)^-1/2 -- one memory-bound pass per pooled graph,
    shared by every conv that runs on that graph (PyG gcn_norm, self-loop weight 1)."""
    deg = jnp.sum(adj.astype(jnp.float32), axis=1, keepdims=True) + 1.0
    return jax.lax.rsqrt(deg)


# ----------------------------------------------------------------------------
# Parameter init (deterministic, synthetic -- matches module shapes, 128-lane padded)
# ----------------------------------------------------------------------------
def _glorot(key, fan_in, fan_out):
    limit = math.sqrt(6.0 / (fan_in + fan_out))
    return jax.random.uniform(key, (fan_in, fan_out), jnp.float32, -limit, limit)


def _pad_w(w):
    return jnp.zeros((C_PAD, C_PAD), jnp.float32).at[:w.shape[0], :w.shape[1]].set(w)


def init_params(key, in_channels, hid_channels, out_channels, ks, sum_res=True):
    assert max(in_channels, out_channels, hid_channels + 1) <= C_PAD
    depth = len(ks)
    keys = iter(jax.random.split(key, 4 * depth + 8))

    down = [{"w": _pad_w(_glorot(next(keys), in_channels, hid_channels)),
             "b": jnp.zeros((1, C_PAD), jnp.float32)}]
    pools = []
    bound = 1.0 / math.sqrt(hid_channels)
    for _ in range(depth):
        pv = jax.random.uniform(next(keys), (hid_channels,), jnp.float32, -bound, bound)
        pv = pv / jnp.sqrt(jnp.sum(pv * pv))     # pre-normalized: 1/||p|| hoisted out of kernel
        pools.append({"p": jnp.zeros((1, C_PAD), jnp.float32).at[0, :hid_channels].set(pv)})
        down.append({"w": _pad_w(_glorot(next(keys), hid_channels, hid_channels)),
                     "b": jnp.zeros((1, C_PAD), jnp.float32)})

    ups = []
    for _ in range(depth):
        if sum_res:
            ups.append({"w": _pad_w(_glorot(next(keys), hid_channels, hid_channels)),
                        "b": jnp.zeros((1, C_PAD), jnp.float32)})
        else:
            w = _glorot(next(keys), 2 * hid_channels, hid_channels)
            ups.append({"w1": _pad_w(w[:hid_channels]), "w2": _pad_w(w[hid_channels:]),
                        "b": jnp.zeros((1, C_PAD), jnp.float32)})
    w = _glorot(next(keys), 2 * hid_channels, out_channels)
    final = {"w1": _pad_w(w[:hid_channels]), "w2": _pad_w(w[hid_channels:]),
             "b": jnp.zeros((1, C_PAD), jnp.float32)}

    # NOTE: the PyTorch module also creates BatchNorm1d layers and an augment_adj
    # helper that its forward() never uses -- omitted here.
    return {"down": down, "pools": pools, "up": ups, "final": final,
            "ks": list(ks), "sum_res": sum_res,
            "hid": hid_channels, "out": out_channels,
            "score_col": hid_channels}   # zero-padded lane used to carry the TopK score


# ----------------------------------------------------------------------------
# Forward pass (mirrors GraphUNet.forward, eval mode)
# ----------------------------------------------------------------------------
def graph_unet_forward(params, x, adj):
    ks = params["ks"]
    depth = len(ks)
    sum_res = params["sum_res"]
    sc = params["score_col"]

    # lane-dense zero-padded channel layout carried through the whole network
    x = jnp.pad(x, ((0, 0), (0, C_PAD - x.shape[1])))
    # adjacency in bf16 (edge weights = 1.0 are exact): halves N^2 traffic / VMEM tile
    adj = adj.astype(jnp.bfloat16)
    dis = gcn_degree_inv_sqrt(adj)

    # down conv 0 (ReLU fused; TopK score for pool 0 fused into lane `sc`)
    x = gcn_conv(adj, dis, x, params["down"][0]["w"], params["down"][0]["b"],
                 p=params["pools"][0]["p"], apply_relu=True, score_col=sc)
    # TODO(synk): dropout(p=0.3) is stochastic train-mode only; eval-mode identity here.
    org_x = x

    xs, adjs, diss, perms = [x], [adj], [dis], []

    for i in range(1, depth + 1):
        # TopKPooling: the score was already produced by the previous fused conv
        score = x[:, sc]
        k = int(math.ceil(ks[i - 1] * x.shape[0]))
        vals, perm = jax.lax.top_k(score, k)        # descending, like torch.topk
        x = x[perm] * vals[:, None]                 # gate selected nodes by tanh score
        # TODO(synk): the dense perm-gather of adj could be fused into the next conv via
        # PrefetchScalarGridSpec + element index maps; kept as plain-JAX glue here.
        adj = adj[perm][:, perm]                    # filter_adj: edges among selected nodes
        dis = gcn_degree_inv_sqrt(adj)

        p_next = params["pools"][i]["p"] if i < depth else None
        x = gcn_conv(adj, dis, x, params["down"][i]["w"], params["down"][i]["b"],
                     p=p_next, apply_relu=True, score_col=sc)
        if i < depth:
            xs.append(x)
            adjs.append(adj)
            diss.append(dis)
        perms.append(perm)

    for i in range(depth):
        j = depth - 1 - i
        res, adj, dis, perm = xs[j], adjs[j], diss[j], perms[j]
        up = jnp.zeros_like(res).at[perm].set(x)    # unpool: scatter back to original slots
        relu_i = i < depth - 1
        if sum_res:
            x = gcn_conv(adj, dis, res + up, params["up"][i]["w"], params["up"][i]["b"],
                         apply_relu=relu_i, score_col=sc)
        else:
            # concat([res, up]) @ W  ==  res @ W1 + up @ W2   (no concat buffer)
            x = gcn_conv(adj, dis, res, params["up"][i]["w1"], params["up"][i]["b"],
                         x2=up, w2=params["up"][i]["w2"], apply_relu=relu_i, score_col=sc)
        # dropout after relu: eval-mode identity

    # final conv on concat([x, org_x]) without materializing the concat
    x = gcn_conv(adj, dis, x, params["final"]["w1"], params["final"]["b"],
                 x2=org_x, w2=params["final"]["w2"], apply_relu=False, score_col=sc)
    return x[:, :params["out"]]


# ----------------------------------------------------------------------------
# Main
# ----------------------------------------------------------------------------
if __name__ == "__main__":
    key = jax.random.PRNGKey(0)
    k_feat, k_param = jax.random.split(key)

    N, in_c, hid_c, out_c = 16, 4, 32, 4
    ks = [0.8, 0.5]

    # node features
    x = jax.random.normal(k_feat, (N, in_c), jnp.float32)

    # undirected ring + a few chords, dense adjacency (edge_weight = 1.0, no self-loops)
    adj = jnp.zeros((N, N), jnp.float32)
    src = jnp.arange(N)
    dst = (src + 1) % N
    adj = adj.at[dst, src].set(1.0).at[src, dst].set(1.0)
    for a_, b_ in [(0, 8), (3, 11), (5, 13)]:
        adj = adj.at[a_, b_].set(1.0).at[b_, a_].set(1.0)

    params = init_params(k_param, in_c, hid_c, out_c, ks, sum_res=True)

    out = graph_unet_forward(params, x, adj)
    out = jax.block_until_ready(out)
    assert out.shape == (N, out_c), out.shape
    assert bool(jnp.all(jnp.isfinite(out)))
    print("KERNEL_OK")
</pallas_src>

<mosaic_0001>
module attributes {stable_mosaic.version = 11 : i64} {
  func.func @_gcn_fused_kernel(%arg0: i32, %arg1: i32, %arg2: memref<16x16xbf16, #tpu.memory_space<vmem>>, %arg3: memref<16x128xf32, #tpu.memory_space<vmem>>, %arg4: memref<16x128xf32, #tpu.memory_space<vmem>>, %arg5: memref<16x1xf32, #tpu.memory_space<vmem>>, %arg6: memref<16x1xf32, #tpu.memory_space<vmem>>, %arg7: memref<128x128xf32, #tpu.memory_space<vmem>>, %arg8: memref<1x128xf32, #tpu.memory_space<vmem>>, %arg9: memref<1x128xf32, #tpu.memory_space<vmem>>, %arg10: memref<16x128xf32, #tpu.memory_space<vmem>>, %arg11: memref<16x128xf32, #tpu.memory_space<vmem>>) attributes {dimension_semantics = [#tpu.dimension_semantics<parallel>, #tpu.dimension_semantics<arbitrary>], iteration_bounds = array<i64: 1, 1>, scalar_prefetch = 0 : i64, scratch_operands = 1 : i64, tpu.core_type = #tpu.core_type<tc>, window_params = [{transform_indices = @transform_0, window_bounds = array<i64: 16, 16>}, {transform_indices = @transform_1, window_bounds = array<i64: 16, 128>}, {transform_indices = @transform_2, window_bounds = array<i64: 16, 128>}, {transform_indices = @transform_3, window_bounds = array<i64: 16, 1>}, {transform_indices = @transform_4, window_bounds = array<i64: 16, 1>}, {pipeline_mode = #tpu.pipeline_mode<synchronous>, transform_indices = @transform_5, window_bounds = array<i64: 128, 128>}, {pipeline_mode = #tpu.pipeline_mode<synchronous>, transform_indices = @transform_6, window_bounds = array<i64: 1, 128>}, {pipeline_mode = #tpu.pipeline_mode<synchronous>, transform_indices = @transform_7, window_bounds = array<i64: 1, 128>}, {transform_indices = @transform_8, window_bounds = array<i64: 16, 128>}]} {
    %c0_i32 = arith.constant 0 : i32
    %0 = arith.cmpi eq, %arg1, %c0_i32 : i32
    %1 = arith.extui %0 : i1 to i32
    %c0_i32_0 = arith.constant 0 : i32
    %2 = arith.cmpi ne, %1, %c0_i32_0 : i32
    scf.if %2 {
      %cst_15 = arith.constant 0.000000e+00 : f32
      %20 = vector.broadcast %cst_15 : f32 to vector<16x128xf32>
      %c0_16 = arith.constant 0 : index
      %c0_17 = arith.constant 0 : index
      %21 = vector.load %arg11[%c0_16, %c0_17] : memref<16x128xf32, #tpu.memory_space<vmem>>, vector<16x128xf32>
      tpu.vector_store %arg11[%c0_16, %c0_17], %20 {strides = array<i32>} : memref<16x128xf32, #tpu.memory_space<vmem>>, vector<16x128xf32>,
    } else {
    }
    %c0 = arith.constant 0 : index
    %c0_1 = arith.constant 0 : index
    %3 = vector.load %arg5[%c0, %c0_1] : memref<16x1xf32, #tpu.memory_space<vmem>>, vector<16x1xf32>
    %c0_2 = arith.constant 0 : index
    %c0_3 = arith.constant 0 : index
    %4 = vector.load %arg3[%c0_2, %c0_3] : memref<16x128xf32, #tpu.memory_space<vmem>>, vector<16x128xf32>
    %5 = arith.truncf %4 : vector<16x128xf32> to vector<16x128xbf16>
    %c0_4 = arith.constant 0 : index
    %c0_5 = arith.constant 0 : index
    %6 = vector.load %arg7[%c0_4, %c0_5] : memref<128x128xf32, #tpu.memory_space<vmem>>, vector<128x128xf32>
    %7 = arith.truncf %6 : vector<128x128xf32> to vector<128x128xbf16>
    %cst = arith.constant dense<0.000000e+00> : vector<16x128xf32>
    %8 = tpu.matmul %5, %7, %cst {dimension_numbers = #tpu.dot_dimension_numbers<[1], [0], [0], [1], [0, 0, 1, 1], [], []>} : vector<16x128xbf16>, vector<128x128xbf16>, vector<16x128xf32> -> vector<16x128xf32>
    %9 = vector.broadcast %3 : vector<16x1xf32> to vector<16x128xf32>
    %10 = arith.mulf %9, %8 : vector<16x128xf32>
    %c0_6 = arith.constant 0 : index
    %c0_7 = arith.constant 0 : index
    %11 = vector.load %arg11[%c0_6, %c0_7] : memref<16x128xf32, #tpu.memory_space<vmem>>, vector<16x128xf32>
    %c0_8 = arith.constant 0 : index
    %c0_9 = arith.constant 0 : index
    %12 = vector.load %arg2[%c0_8, %c0_9] : memref<16x16xbf16, #tpu.memory_space<vmem>>, vector<16x16xbf16>
    %13 = arith.truncf %10 : vector<16x128xf32> to vector<16x128xbf16>
    %cst_10 = arith.constant dense<0.000000e+00> : vector<16x128xf32>
    %14 = tpu.matmul %12, %13, %cst_10 {dimension_numbers = #tpu.dot_dimension_numbers<[1], [0], [0], [1], [0, 0, 1, 1], [], []>} : vector<16x16xbf16>, vector<16x128xbf16>, vector<16x128xf32> -> vector<16x128xf32>
    %15 = arith.addf %11, %14 : vector<16x128xf32>
    %c0_11 = arith.constant 0 : index
    %c0_12 = arith.constant 0 : index
    %16 = vector.load %arg11[%c0_11, %c0_12] : memref<16x128xf32, #tpu.memory_space<vmem>>, vector<16x128xf32>
    tpu.vector_store %arg11[%c0_11, %c0_12], %15 {strides = array<i32>} : memref<16x128xf32, #tpu.memory_space<vmem>>, vector<16x128xf32>,
    %c0_i32_13 = arith.constant 0 : i32
    %17 = arith.cmpi eq, %arg1, %c0_i32_13 : i32
    %18 = arith.extui %17 : i1 to i32
    %c0_i32_14 = arith.constant 0 : i32
    %19 = arith.cmpi ne, %18, %c0_i32_14 : i32
    scf.if %19 {
      %c0_15 = arith.constant 0 : index
      %c0_16 = arith.constant 0 : index
      %20 = vector.load %arg6[%c0_15, %c0_16] : memref<16x1xf32, #tpu.memory_space<vmem>>, vector<16x1xf32>
      %c0_17 = arith.constant 0 : index
      %c0_18 = arith.constant 0 : index
      %21 = vector.load %arg11[%c0_17, %c0_18] : memref<16x128xf32, #tpu.memory_space<vmem>>, vector<16x128xf32>
      %22 = arith.addf %21, %10 : vector<16x128xf32>
      %23 = vector.broadcast %20 : vector<16x1xf32> to vector<16x128xf32>
      %24 = arith.mulf %23, %22 : vector<16x128xf32>
      %c0_19 = arith.constant 0 : index
      %c0_20 = arith.constant 0 : index
      %25 = vector.load %arg8[%c0_19, %c0_20] : memref<1x128xf32, #tpu.memory_space<vmem>>, vector<1x128xf32>
      %26 = vector.broadcast %25 : vector<1x128xf32> to vector<16x128xf32>
      %27 = arith.addf %24, %26 : vector<16x128xf32>
      %cst_21 = arith.constant 0.000000e+00 : f32
      %28 = vector.broadcast %cst_21 : f32 to vector<16x128xf32>
      %29 = arith.maximumf %27, %28 : vector<16x128xf32>
      %c0_22 = arith.constant 0 : index
      %c0_23 = arith.constant 0 : index
      %30 = vector.load %arg9[%c0_22, %c0_23] : memref<1x128xf32, #tpu.memory_space<vmem>>, vector<1x128xf32>
      %31 = vector.broadcast %30 : vector<1x128xf32> to vector<16x128xf32>
      %32 = arith.mulf %29, %31 : vector<16x128xf32>
      %cst_24 = arith.constant dense<0.000000e+00> : vector<16xf32>
      %33 = vector.multi_reduction <add>, %32, %cst_24 [1] : vector<16x128xf32> to vector<16xf32>
      %34 = vector.shape_cast %33 : vector<16xf32> to vector<16x1xf32>
      %35 = math.tanh %34 : vector<16x1xf32>
      %36 = tpu.iota {dimensions = array<i32: 1>} : vector<16x128xi32>
      %c32_i32 = arith.constant 32 : i32
      %37 = vector.broadcast %c32_i32 : i32 to vector<16x128xi32>
      %38 = arith.cmpi eq, %36, %37 : vector<16x128xi32>
      %39 = vector.shape_cast %35 : vector<16x1xf32> to vector<16x1xf32>
      %40 = vector.broadcast %39 : vector<16x1xf32> to vector<16x128xf32>
      %41 = arith.select %38, %40, %29 : vector<16x128xi1>, vector<16x128xf32>
      %c0_25 = arith.constant 0 : index
      %c0_26 = arith.constant 0 : index
      %42 = vector.load %arg10[%c0_25, %c0_26] : memref<16x128xf32, #tpu.memory_space<vmem>>, vector<16x128xf32>
      tpu.vector_store %arg10[%c0_25, %c0_26], %41 {strides = array<i32>} : memref<16x128xf32, #tpu.memory_space<vmem>>, vector<16x128xf32>,
    } else {
    }
    return
  }
  func.func @transform_0(%arg0: i32, %arg1: i32) -> (i32, i32) {
    %c0_i32 = arith.constant 0 : i32
    return %arg0, %arg1 : i32, i32
  }
  func.func @transform_1(%arg0: i32, %arg1: i32) -> (i32, i32) {
    %c0_i32 = arith.constant 0 : i32
    %c0_i32_0 = arith.constant 0 : i32
    return %arg1, %c0_i32 : i32, i32
  }
  func.func @transform_2(%arg0: i32, %arg1: i32) -> (i32, i32) {
    %c0_i32 = arith.constant 0 : i32
    %c0_i32_0 = arith.constant 0 : i32
    return %arg0, %c0_i32 : i32, i32
  }
  func.func @transform_3(%arg0: i32, %arg1: i32) -> (i32, i32) {
    %c0_i32 = arith.constant 0 : i32
    %c0_i32_0 = arith.constant 0 : i32
    return %arg1, %c0_i32 : i32, i32
  }
  func.func @transform_4(%arg0: i32, %arg1: i32) -> (i32, i32) {
    %c0_i32 = arith.constant 0 : i32
    %c0_i32_0 = arith.constant 0 : i32
    return %arg0, %c0_i32 : i32, i32
  }
  func.func @transform_5(%arg0: i32, %arg1: i32) -> (i32, i32) {
    %c0_i32 = arith.constant 0 : i32
    %c0_i32_0 = arith.constant 0 : i32
    %c0_i32_1 = arith.constant 0 : i32
    return %c0_i32, %c0_i32_0 : i32, i32
  }
  func.func @transform_6(%arg0: i32, %arg1: i32) -> (i32, i32) {
    %c0_i32 = arith.constant 0 : i32
    %c0_i32_0 = arith.constant 0 : i32
    %c0_i32_1 = arith.constant 0 : i32
    return %c0_i32, %c0_i32_0 : i32, i32
  }
  func.func @transform_7(%arg0: i32, %arg1: i32) -> (i32, i32) {
    %c0_i32 = arith.constant 0 : i32
    %c0_i32_0 = arith.constant 0 : i32
    %c0_i32_1 = arith.constant 0 : i32
    return %c0_i32, %c0_i32_0 : i32, i32
  }
  func.func @transform_8(%arg0: i32, %arg1: i32) -> (i32, i32) {
    %c0_i32 = arith.constant 0 : i32
    %c0_i32_0 = arith.constant 0 : i32
    return %arg0, %c0_i32 : i32, i32
  }
}

</mosaic_0001>

<bundles_post_ra>
// kernel: tpu_custom_call.1
= control target key start
LH: loop header
LB: loop body
LE: loop exit
PB: predicated region body
PF: predicated region fallthrough
CT: control target
= control target key end

     0   :  { %13 = vsyncpa [#allocation4], 0  ;;  %s496_s0 = inlined_call_operand.hbm [shape: bf16[16,16], index: 0, kind: input, shape index: {}]   ;;  %s497_s1 = inlined_call_operand.vmem [shape: f32[16,128], index: 1, kind: input, shape index: {}]   ;;  %s498_s2 = inlined_call_operand.vmem [shape: f32[16,128], index: 2, kind: input, shape index: {}]   ;;  %s499_s3 = inlined_call_operand.vmem [shape: f32[16,1], index: 3, kind: input, shape index: {}]   ;;  %s500_s4 = inlined_call_operand.vmem [shape: f32[16,1], index: 4, kind: input, shape index: {}]   ;;  %s501_s5 = inlined_call_operand.hbm [shape: f32[128,128], index: 5, kind: input, shape index: {}]   ;;  %s502_s6 = inlined_call_operand.vmem [shape: f32[1,128], index: 6, kind: input, shape index: {}]   ;;  %s503_s7 = inlined_call_operand.vmem [shape: f32[1,128], index: 7, kind: input, shape index: {}]   ;;  %s504_s8 = inlined_call_operand.hbm [shape: f32[16,128], index: 8, kind: output, shape index: {}]  }
   0x1   :  { %14 = vsyncpa [#allocation7], 0 }
   0x2   :  { %15 = vsyncpa [#allocation5], 0  ;;  %s402_s2 = smov [#allocation3]  }
   0x3   :  { %s21_s27 = sshll.u32 %s402_s2, 4  ;;  %s22_s27 = int_to_ptr.vmem [resolvable:$true] %s21_s27 }
   0x4   :  { %s344_s28 = scalar_lea.vmem %s22_s27, 128  ;;  %p349_p1 = scmp.lt.s32.totalorder %s22_s27, %s22_s27 }
   0x5   :  { %p345_p0 = scmp.ne.s32.totalorder %s22_s27, %s344_s28  ;;  %p350_p2 = scmp.lt.s32.totalorder %s344_s28, %s344_s28 }
   0x7   :  { %p351_p3 = por %p350_p2, %p349_p1 }
   0x9   :  { %p352_p4 = pnand %p351_p3, %p345_p0 }
   0xb   :  { %355 = shalt.err (!%p352_p4)
}
   0xc   :  { %s403_s29 = smov 64   ;;  %s404_s30 = smov 4  }
   0xd   :  { %27 = dma.hbm_to_vmem [thread:$0]  %s496_s0, 128, %s22_s27, [#allocation4], %s403_s29, %s403_s29, %s404_s30  }
   0xe   :  { %s405_s11 = smov [#allocation6]  }
   0xf   :  { %s41_s12 = sshll.u32 %s405_s11, 4  ;;  %s42_s12 = int_to_ptr.vmem [resolvable:$true] %s41_s12 }
  0x10   :  { %s364_s13 = scalar_lea.vmem %s42_s12, 2048  ;;  %p369_p6 = scmp.lt.s32.totalorder %s42_s12, %s42_s12 }
  0x11   :  { %p365_p5 = scmp.ne.s32.totalorder %s42_s12, %s364_s13  ;;  %p370_p7 = scmp.lt.s32.totalorder %s364_s13, %s364_s13 }
  0x13   :  { %p371_p8 = por %p370_p7, %p369_p6 }
  0x15   :  { %p372_p9 = pnand %p371_p8, %p365_p5 }
  0x17   :  { %375 = shalt.err (!%p372_p9)
}
  0x18   :  { %s406_s14 = smov 128   ;;  %s407_s15 = smov 8  }
  0x19   :  { %47 = dma.hbm_to_vmem [thread:$0]  %s501_s5, 2048, %s42_s12, [#allocation7], %s406_s14, %s406_s14, %s407_s15  }
  0x1a   :  { %396 = dma.done.wait [#allocation4], 128  }
  0x1b   :  { %397 = vsyncadd [#allocation4], 4294967168 }
  0x1c   :  { %398 = dma.done.wait [#allocation7], 2048  }
  0x1d   :  { %399 = vsyncadd [#allocation7], 4294965248  ;;  %v408_v0 = vmov 0.0   ;;  %vm409_vm0 = vmmov 0   ;;  %v410_v1 = vmov 0   ;;  %v84_v2 = vld [vmem:[#allocation6 + $0x70] sm:$0xff]  ;;  %v253_v63 = vlaneseq }
  0x1e   :  { %293 = vmatprep.subr.bf16.mxu0 %v408_v0  ;;  %309 = vmatprep.mubr.msk.bf16.mxu0 %vm409_vm0, %v408_v0  ;;  %v85_v3 = vld [vmem:[#allocation6 + $0x78] sm:$0xff]  ;;  %v82_v4 = vld [vmem:[#allocation6 + $0x60] sm:$0xff]  ;;  %v83_v6 = vld [vmem:[#allocation6 + $0x68] sm:$0xff]  ;;  %vm157_vm1 = vcmask 130048  }
  0x1f   :  { %329 = vset.pattern.permute.xlu0 %v410_v1  ;;  %313 = vmatprep.subr.bf16.mxu1 %v408_v0  ;;  %v93_v5 = vpack.c.bf16 %v85_v3, %v84_v2  ;;  %v92_v7 = vpack.c.bf16 %v83_v6, %v82_v4  ;;  %v80_v8 = vld [vmem:[#allocation6 + $0x50] sm:$0xff]  ;;  %v81_v9 = vld [vmem:[#allocation6 + $0x58] sm:$0xff]  ;;  %v78_v12 = vld [vmem:[#allocation6 + $0x40] sm:$0xff] }
  0x20   :  { %315 = vmatprep.mubr.msk.bf16.mxu1 %vm409_vm0, %v408_v0  ;;  %330 = vset.pattern.permute.xlu1 %v410_v1  ;;  %v65_v10 = vld [vmem:[%s499_s3] sm:$0xff]  ;;  %v91_v11 = vpack.c.bf16 %v81_v9, %v80_v8  ;;  %v79_v13 = vld [vmem:[#allocation6 + $0x48] sm:$0xff]  ;;  %v66_v14 = vld [vmem:[%s499_s3 + $0x8] sm:$0xff] }
  0x21   :  { %294 = vmatpush3.bf16.msra.mxu0 %v93_v5  ;;  %137 = vperm.xlu0 %329, %v65_v10   ;;  %v90_v15 = vpack.c.bf16 %v79_v13, %v78_v12  ;;  %v76_v16 = vld [vmem:[#allocation6 + $0x30] sm:$0xff]  ;;  %v77_v17 = vld [vmem:[#allocation6 + $0x38] sm:$0xff]  ;;  %v74_v19 = vld [vmem:[#allocation6 + $0x20] sm:$0xff] }
  0x22   :  { %295 = vmatprep.subr.bf16.mxu0 %v408_v0  ;;  %v89_v18 = vpack.c.bf16 %v77_v17, %v76_v16  ;;  %v75_v20 = vld [vmem:[#allocation6 + $0x28] sm:$0xff]  ;;  %v72_v22 = vld [vmem:[#allocation6 + $0x10] sm:$0xff]  ;;  %v73_v23 = vld [vmem:[#allocation6 + $0x18] sm:$0xff] }
  0x23   :  { %v88_v21 = vpack.c.bf16 %v75_v20, %v74_v19  ;;  %v87_v24 = vpack.c.bf16 %v73_v23, %v72_v22  ;;  %v70_v25 = vld [vmem:[#allocation6] sm:$0xff]  ;;  %v71_v26 = vld [vmem:[#allocation6 + $0x8] sm:$0xff]  ;;  %v67_v28 = vld [vmem:[%s497_s1] sm:$0xff] }
  0x24   :  { %v86_v27 = vpack.c.bf16 %v71_v26, %v70_v25  ;;  %v68_v29 = vld [vmem:[%s497_s1 + $0x8] sm:$0xff]  ;;  %v209_v31 = vld [vmem:[%s500_s4] sm:$0xff] }
  0x25   :  { %296 = vmatpush3.bf16.msra.mxu0 %v92_v7  ;;  %142 = vperm.xlu0 %329, %v66_v14   ;;  %v69_v30 = vpack.c.bf16 %v68_v29, %v67_v28  ;;  %v210_v32 = vld [vmem:[%s500_s4 + $0x8] sm:$0xff]  ;;  %v331_v42 = vld [vmem:[#allocation3] sm:$0xff]  }
  0x26   :  { %297 = vmatprep.subr.bf16.mxu0 %v408_v0  ;;  %217 = vperm.xlu1 %330, %v209_v31   ;;  %v280_v47 = vld [vmem:[%s502_s6] ss:$0 sm:$0xff]  ;;  %s411_s6 = smov [#allocation8]  }
  0x27   :  { %v281_v54 = vld [vmem:[%s503_s7] ss:$0 sm:$0xff]  ;;  %s265_s28 = sshll.u32 %s411_s6, 4  ;;  %s266_s28 = int_to_ptr.vmem [resolvable:$true] %s265_s28 }
  0x28   :  { %s376_s7 = scalar_lea.vmem %s266_s28, 256  ;;  %p381_p11 = scmp.lt.s32.totalorder %s266_s28, %s266_s28 }
  0x29   :  { %298 = vmatpush3.bf16.msra.mxu0 %v91_v11  ;;  %p377_p10 = scmp.ne.s32.totalorder %s266_s28, %s376_s7  ;;  %p382_p12 = scmp.lt.s32.totalorder %s376_s7, %s376_s7 }
  0x2a   :  { %299 = vmatprep.subr.bf16.mxu0 %v408_v0  ;;  %222 = vperm.xlu1 %330, %v210_v32  }
  0x2b   :  { %p383_p13 = por %p382_p12, %p381_p11 }
  0x2d   :  { %300 = vmatpush3.bf16.msra.mxu0 %v90_v15  ;;  %p384_p0 = pnand %p383_p13, %p377_p10 }
  0x2e   :  { %301 = vmatprep.subr.bf16.mxu0 %v408_v0 }
  0x31   :  { %302 = vmatpush3.bf16.msra.mxu0 %v89_v18 }
  0x32   :  { %303 = vmatprep.subr.bf16.mxu0 %v408_v0 }
  0x35   :  { %304 = vmatpush3.bf16.msra.mxu0 %v88_v21 }
  0x36   :  { %305 = vmatprep.subr.bf16.mxu0 %v408_v0 }
  0x39   :  { %306 = vmatpush3.bf16.msra.mxu0 %v87_v24 }
  0x3a   :  { %307 = vmatprep.subr.bf16.mxu0 %v408_v0  ;;  %v254_v0 = vand.u32 127, %v253_v63 }
  0x3c   :  { %vm255_vm2 = vcmp.eq.s32.totalorder %v254_v0, 32 }
  0x3d   :  { %308 = vmatpush3.bf16.msra.mxu0 %v86_v27 }
  0x40   :  { %310 = vmatmul.mubr.bf16.vlgmr.msra.gmra.mxu0 %v69_v30 }
  0x9c   :  { %v138_v33 = vpop.permute.xlu0 %137 }
  0xa0   :  { %v143_v36 = vpop.permute.xlu0 %142 }
  0xa1   :  { %v218_v43 = vpop.permute.xlu1 %217 }
  0xa5   :  { %v223_v52 = vpop.permute.xlu1 %222 }
 0x100   :  { %v128_v34 = vpop.f32.mrf.mxu0 }
 0x101   :  { %v145_v38 = vmul.f32 %v138_v33, %v128_v34 }
 0x102   :  { %v311_v35 = vpop.f32.mrf.mxu0 }
 0x104   :  { %v131_v37 = vpop.f32.mrf.mxu0 }
 0x105   :  { %v146_v39 = vmul.f32 %v143_v36, %v131_v37 }
 0x106   :  { %v312_v40 = vpop.f32.mrf.mxu0 }
 0x107   :  { %v151_v41 = vpack.c.bf16 %v146_v39, %v145_v38 }
 0x109   :  { %314 = vmatpush3.bf16.msra.mxu1 %v151_v41 }
 0x10c   :  { %316 = vmatmul.mubr.msk.bf16.vlgmr.msra.gmra.mxu1 %vm157_vm1, %v331_v42 }
 0x1cc   :  { %v195_v44 = vpop.f32.mrf.mxu1 }
 0x1cd   :  { %v213_v45 = vadd.f32 %v195_v44, %v145_v38 }
 0x1ce   :  { %v317_v46 = vpop.f32.mrf.mxu1 }
 0x1cf   :  { %v225_v48 = vmul.f32 %v218_v43, %v213_v45 }
 0x1d0   :  { %v198_v49 = vpop.f32.mrf.mxu1 }
 0x1d1   :  { %v214_v50 = vadd.f32 %v198_v49, %v146_v39  ;;  %v234_v51 = vadd.f32 %v280_v47, %v225_v48 }
 0x1d2   :  { %v318_v53 = vpop.f32.mrf.mxu1 }
 0x1d3   :  { %v226_v55 = vmul.f32 %v223_v52, %v214_v50  ;;  %v236_v56 = vmax.f32 %v234_v51, 0.0 }
 0x1d5   :  { %v245_v57 = vmul.f32 %v281_v54, %v236_v56  ;;  %v235_v58 = vadd.f32 %v280_v47, %v226_v55 }
 0x1d7   :  { %247 = vadd.xlane.f32.xlu0 %v245_v57  ;;  %v237_v59 = vmax.f32 %v235_v58, 0.0 }
 0x1d9   :  { %v246_v60 = vmul.f32 %v281_v54, %v237_v59 }
 0x1db   :  { %249 = vadd.xlane.f32.xlu1 %v246_v60 }
 0x260   :  { %v248_v61 = vpop.xlane.xlu0 %247 }
 0x261   :  { %332 = vtanh.f32 %v248_v61 }
 0x264   :  { %v250_v62 = vpop.xlane.xlu1 %249 }
 0x265   :  { %334 = vtanh.f32 %v250_v62 }
 0x26e   :  { %v333_v1 = vpop.eup %332 }
 0x26f   :  { %v256_v2 = vsel %vm255_vm2, %v333_v1, %v236_v56 }
 0x270   :  { %258 = vst [vmem:[#allocation8] sm:$0xff] %v256_v2 }
 0x272   :  { %v335_v3 = vpop.eup %334 }
 0x273   :  { %v257_v4 = vsel %vm255_vm2, %v335_v3, %v237_v59 }
 0x274   :  { %259 = vst [vmem:[#allocation8 + $0x8] sm:$0xff] %v257_v4 }
 0x275   :  { %387 = shalt.err (!%p384_p0)
}
 0x276   :  { %271 = dma.vmem_to_hbm [thread:$0]  %s266_s28, 256, %s504_s8, [#allocation5], %s406_s14, %s406_s14, %s407_s15  }
 0x277   :  { %400 = dma.done.wait [#allocation5], 256  }
 0x278   :  { %401 = vsyncadd [#allocation5], 4294967040 }
 0x279   :  { %275 = vsyncpa [#allocation4], 1 }
 0x27a   :  { %276 = vsyncpa [#allocation7], 1 }
 0x27b   :  { %277 = vsyncpa [#allocation5], 1 }

</bundles_post_ra>
